<compile_context>
chip_gen: v7x
topology: tpu7x:2x2x1
jax: 0.10.0
libtpu: 0.0.40
codegen_flags: <defaults>
</compile_context>

<pallas_src>
import functools

import jax
import jax.numpy as jnp
from jax.experimental import pallas as pl
from jax.experimental.pallas import tpu as pltpu

_HIDDEN = 64
_LANE = 128


def _mlp_kernel(x_ref, w1_ref, b1_ref, w2_ref, b2_ref, w3_ref, b3_ref, o_ref):
    """Fused 3-layer MLP on one (TB, d) batch tile (everything VMEM-resident)."""
    # In-kernel cast to the MXU compute dtype (saves a wrapper-side HBM pass over x).
    x = x_ref[...].astype(w1_ref.dtype)                                # (TB, d)
    # Layer 1: MXU matmul, f32 accumulation; bias/ReLU in f32 (v5e has no bf16 VPU).
    h1 = jnp.dot(x, w1_ref[...], preferred_element_type=jnp.float32) + b1_ref[...]
    h1 = jnp.maximum(h1, 0.0)
    # Layer 2: cast back to the MXU input dtype, accumulate in f32.
    h1 = h1.astype(w2_ref.dtype)
    h2 = jnp.dot(h1, w2_ref[...], preferred_element_type=jnp.float32) + b2_ref[...]
    h2 = jnp.maximum(h2, 0.0)                                          # (TB, 64) f32
    # Layer 3 (64 -> 1): VPU multiply + XLU lane reduction instead of an N=1 MXU matmul.
    o3 = jnp.sum(h2 * w3_ref[...], axis=-1, keepdims=True) + b3_ref[...]   # (TB, 1)
    o_ref[...] = o3.astype(o_ref.dtype)


def _round_up(x, m):
    return ((x + m - 1) // m) * m


def _vmem_budget():
    """Per-generation scoped-VMEM limit and per-tile footprint budget (bytes)."""
    cap = 64 * 1024 * 1024                     # conservative default: v7x per-TC VMEM
    try:
        info = pltpu.get_tpu_info()
        cap = int(getattr(info, "vmem_capacity_bytes", cap))
    except Exception:
        pass
    vmem_limit = (3 * cap) // 4                # 48 MiB on v7x, 96 MiB on v5e/v6e
    vmem_limit = max(32 * 1024 * 1024, min(vmem_limit, 96 * 1024 * 1024))
    return vmem_limit, vmem_limit // 2


def _choose_block_b(B, d, x_itemsize, w_itemsize, budget_bytes):
    """Largest batch tile (<= 2048, multiple of 128) whose pipelined footprint fits."""
    b_ceil = _round_up(B, 8)

    def footprint(tb):
        x_cols = _round_up(d, _LANE)
        x_tiles = 2 * tb * x_cols * x_itemsize            # double-buffered x blocks
        w1_buf = 2 * d * _LANE * w_itemsize               # w1 double buffers (64->128 lanes)
        w2_buf = 2 * _HIDDEN * _LANE * w_itemsize         # w2 double buffers
        small = 4 * 2 * 8 * _LANE * 4                     # b1,b2,w3,b3 pad to (8,128) f32
        acts = 3 * tb * _HIDDEN * 4                       # f32 intermediates
        out = 2 * tb * _LANE * 4                          # (tb,1) f32 blocks pad to 128 lanes
        return x_tiles + w1_buf + w2_buf + small + acts + out

    tb = 2048
    while tb > 128 and footprint(tb) > budget_bytes:
        tb -= 128
    tb = max(tb, 8)
    return max(8, min(tb, b_ceil))


@functools.partial(jax.jit, static_argnames=("block_b", "compute_dtype"))
def linear_prob_forward(x, params, *, block_b=None, compute_dtype=jnp.bfloat16):
    """Forward pass of LinearProb.

    x: (B, d) — streamed in its input dtype; cast to `compute_dtype` inside the kernel.
    params: dict with
      w1: (d, 64)   (= torch linear1.weight.T)      b1: (1, 64)
      w2: (64, 64)  (= torch linear2.weight.T)      b2: (1, 64)
      w3: (1, 64)   (= torch linear3.weight, a row) b3: (1, 1)
    Returns (B, 1) float32, matching torch's y = x @ W.T + b semantics.
    """
    B, d = x.shape
    f32 = jnp.float32

    # Tiny one-time casts for the MXU weight operands; everything else stays f32.
    w1 = params["w1"].astype(compute_dtype)
    w2 = params["w2"].astype(compute_dtype)
    b1 = params["b1"].astype(f32)
    b2 = params["b2"].astype(f32)
    w3 = params["w3"].astype(f32)
    b3 = params["b3"].astype(f32)

    vmem_limit, tile_budget = _vmem_budget()
    tb = block_b if block_b is not None else _choose_block_b(
        B, d, x.dtype.itemsize, jnp.dtype(compute_dtype).itemsize, tile_budget)
    assert tb % 8 == 0, "block_b must be a multiple of 8"
    n_tiles = pl.cdiv(B, tb)   # ragged last block handled by Pallas (masked output store)

    cost = pl.CostEstimate(
        flops=2 * B * (d * _HIDDEN + _HIDDEN * _HIDDEN + _HIDDEN),
        transcendentals=0,
        bytes_accessed=(x.size * x.dtype.itemsize
                        + w1.size * w1.dtype.itemsize
                        + w2.size * w2.dtype.itemsize
                        + (b1.size + b2.size + w3.size + b3.size) * 4
                        + B * 4),
    )

    out = pl.pallas_call(
        _mlp_kernel,
        out_shape=jax.ShapeDtypeStruct((B, 1), f32),
        grid=(n_tiles,),
        in_specs=[
            pl.BlockSpec((tb, d), lambda i: (i, 0)),    # x: streamed / double-buffered
            pl.BlockSpec(w1.shape, lambda i: (0, 0)),   # weights & biases: VMEM-resident
            pl.BlockSpec(b1.shape, lambda i: (0, 0)),
            pl.BlockSpec(w2.shape, lambda i: (0, 0)),
            pl.BlockSpec(b2.shape, lambda i: (0, 0)),
            pl.BlockSpec(w3.shape, lambda i: (0, 0)),
            pl.BlockSpec(b3.shape, lambda i: (0, 0)),
        ],
        out_specs=pl.BlockSpec((tb, 1), lambda i: (i, 0)),
        compiler_params=pltpu.CompilerParams(
            dimension_semantics=("parallel",),          # independent batch tiles
            vmem_limit_bytes=int(vmem_limit),           # per-generation scoped VMEM
        ),
        cost_estimate=cost,
    )(x, w1, b1, w2, b2, w3, b3)

    return out


def init_params(key, d, hidden=_HIDDEN):
    """Deterministic synthetic init (PyTorch-Linear-like uniform bounds)."""
    ks = jax.random.split(key, 6)

    def lin(kw, kb, fan_in, fan_out):
        bound = 1.0 / jnp.sqrt(jnp.float32(fan_in))
        w = jax.random.uniform(kw, (fan_in, fan_out), jnp.float32, -bound, bound)
        b = jax.random.uniform(kb, (1, fan_out), jnp.float32, -bound, bound)
        return w, b

    w1, b1 = lin(ks[0], ks[1], d, hidden)
    w2, b2 = lin(ks[2], ks[3], hidden, hidden)
    w3, b3 = lin(ks[4], ks[5], hidden, 1)
    return {"w1": w1, "b1": b1, "w2": w2, "b2": b2,
            "w3": w3.T, "b3": b3}   # w3 stored as a (1, hidden) row


def _reference_f32(x, p):
    h1 = jnp.maximum(x @ p["w1"] + p["b1"], 0.0)
    h2 = jnp.maximum(h1 @ p["w2"] + p["b2"], 0.0)
    return jnp.sum(h2 * p["w3"], axis=-1, keepdims=True) + p["b3"]


def _reference_like_kernel(x, p, compute_dtype):
    """Mirrors the kernel's rounding (x / W1 / W2 / h1 cast to compute_dtype, f32 accum)."""
    f32 = jnp.float32
    cast = lambda a: a.astype(compute_dtype).astype(f32)
    h1 = jnp.maximum(cast(x) @ cast(p["w1"]) + p["b1"], 0.0)
    h2 = jnp.maximum(cast(h1) @ cast(p["w2"]) + p["b2"], 0.0)
    return jnp.sum(h2 * p["w3"], axis=-1, keepdims=True) + p["b3"]


if __name__ == "__main__":
    key = jax.random.PRNGKey(0)
    k_x, k_p = jax.random.split(key)

    B, d = 20, 32   # ragged B on purpose: exercises the masked partial block
    x = jax.random.normal(k_x, (B, d), jnp.float32)
    params = init_params(k_p, d)

    ref_k = _reference_like_kernel(x, params, jnp.bfloat16)
    ref_f = _reference_f32(x, params)

    # 1) Small explicit tile: multi-step grid with a ragged last block (20 = 8+8+4).
    out_small = jax.block_until_ready(linear_prob_forward(x, params, block_b=8))
    assert out_small.shape == (B, 1)
    assert jnp.allclose(out_small, ref_k, atol=2e-3, rtol=2e-3), "mismatch (block_b=8) vs kernel-rounding ref"
    assert jnp.allclose(out_small, ref_f, atol=3e-2, rtol=3e-2), "mismatch (block_b=8) vs f32 reference"

    # 2) Auto tile selection (real-workload path): single ragged block here.
    out_auto = jax.block_until_ready(linear_prob_forward(x, params))
    assert out_auto.shape == (B, 1)
    assert jnp.allclose(out_auto, ref_k, atol=2e-3, rtol=2e-3), "mismatch (auto) vs kernel-rounding ref"
    assert jnp.allclose(out_auto, ref_f, atol=3e-2, rtol=3e-2), "mismatch (auto) vs f32 reference"

    print("KERNEL_OK")
</pallas_src>

<mosaic_0001>
module attributes {stable_mosaic.version = 11 : i64} {
  func.func @_mlp_kernel(%arg0: i32, %arg1: memref<8x32xf32, #tpu.memory_space<vmem>>, %arg2: memref<32x64xbf16, #tpu.memory_space<vmem>>, %arg3: memref<1x64xf32, #tpu.memory_space<vmem>>, %arg4: memref<64x64xbf16, #tpu.memory_space<vmem>>, %arg5: memref<1x64xf32, #tpu.memory_space<vmem>>, %arg6: memref<1x64xf32, #tpu.memory_space<vmem>>, %arg7: memref<1x1xf32, #tpu.memory_space<vmem>>, %arg8: memref<8x1xf32, #tpu.memory_space<vmem>>) attributes {dimension_semantics = [#tpu.dimension_semantics<parallel>], iteration_bounds = array<i64: 3>, scalar_prefetch = 0 : i64, scratch_operands = 0 : i64, tpu.core_type = #tpu.core_type<tc>, window_params = [{transform_indices = @transform_0, window_bounds = array<i64: 8, 32>}, {pipeline_mode = #tpu.pipeline_mode<synchronous>, transform_indices = @transform_1, window_bounds = array<i64: 32, 64>}, {pipeline_mode = #tpu.pipeline_mode<synchronous>, transform_indices = @transform_2, window_bounds = array<i64: 1, 64>}, {pipeline_mode = #tpu.pipeline_mode<synchronous>, transform_indices = @transform_3, window_bounds = array<i64: 64, 64>}, {pipeline_mode = #tpu.pipeline_mode<synchronous>, transform_indices = @transform_4, window_bounds = array<i64: 1, 64>}, {pipeline_mode = #tpu.pipeline_mode<synchronous>, transform_indices = @transform_5, window_bounds = array<i64: 1, 64>}, {pipeline_mode = #tpu.pipeline_mode<synchronous>, transform_indices = @transform_6, window_bounds = array<i64: 1, 1>}, {transform_indices = @transform_7, window_bounds = array<i64: 8, 1>}]} {
    %c0 = arith.constant 0 : index
    %c0_0 = arith.constant 0 : index
    %0 = vector.load %arg1[%c0, %c0_0] : memref<8x32xf32, #tpu.memory_space<vmem>>, vector<8x32xf32>
    %1 = arith.truncf %0 : vector<8x32xf32> to vector<8x32xbf16>
    %c0_1 = arith.constant 0 : index
    %c0_2 = arith.constant 0 : index
    %2 = vector.load %arg2[%c0_1, %c0_2] : memref<32x64xbf16, #tpu.memory_space<vmem>>, vector<32x64xbf16>
    %cst = arith.constant dense<0.000000e+00> : vector<8x64xf32>
    %3 = tpu.matmul %1, %2, %cst {dimension_numbers = #tpu.dot_dimension_numbers<[1], [0], [0], [1], [0, 0, 1, 1], [], []>} : vector<8x32xbf16>, vector<32x64xbf16>, vector<8x64xf32> -> vector<8x64xf32>
    %c0_3 = arith.constant 0 : index
    %c0_4 = arith.constant 0 : index
    %4 = vector.load %arg3[%c0_3, %c0_4] : memref<1x64xf32, #tpu.memory_space<vmem>>, vector<1x64xf32>
    %5 = vector.broadcast %4 : vector<1x64xf32> to vector<8x64xf32>
    %6 = arith.addf %3, %5 : vector<8x64xf32>
    %cst_5 = arith.constant 0.000000e+00 : f32
    %7 = vector.broadcast %cst_5 : f32 to vector<8x64xf32>
    %8 = arith.maximumf %6, %7 : vector<8x64xf32>
    %9 = arith.truncf %8 : vector<8x64xf32> to vector<8x64xbf16>
    %c0_6 = arith.constant 0 : index
    %c0_7 = arith.constant 0 : index
    %10 = vector.load %arg4[%c0_6, %c0_7] : memref<64x64xbf16, #tpu.memory_space<vmem>>, vector<64x64xbf16>
    %cst_8 = arith.constant dense<0.000000e+00> : vector<8x64xf32>
    %11 = tpu.matmul %9, %10, %cst_8 {dimension_numbers = #tpu.dot_dimension_numbers<[1], [0], [0], [1], [0, 0, 1, 1], [], []>} : vector<8x64xbf16>, vector<64x64xbf16>, vector<8x64xf32> -> vector<8x64xf32>
    %c0_9 = arith.constant 0 : index
    %c0_10 = arith.constant 0 : index
    %12 = vector.load %arg5[%c0_9, %c0_10] : memref<1x64xf32, #tpu.memory_space<vmem>>, vector<1x64xf32>
    %13 = vector.broadcast %12 : vector<1x64xf32> to vector<8x64xf32>
    %14 = arith.addf %11, %13 : vector<8x64xf32>
    %cst_11 = arith.constant 0.000000e+00 : f32
    %15 = vector.broadcast %cst_11 : f32 to vector<8x64xf32>
    %16 = arith.maximumf %14, %15 : vector<8x64xf32>
    %c0_12 = arith.constant 0 : index
    %c0_13 = arith.constant 0 : index
    %17 = vector.load %arg6[%c0_12, %c0_13] : memref<1x64xf32, #tpu.memory_space<vmem>>, vector<1x64xf32>
    %18 = vector.broadcast %17 : vector<1x64xf32> to vector<8x64xf32>
    %19 = arith.mulf %16, %18 : vector<8x64xf32>
    %cst_14 = arith.constant dense<0.000000e+00> : vector<8xf32>
    %20 = vector.multi_reduction <add>, %19, %cst_14 [1] : vector<8x64xf32> to vector<8xf32>
    %21 = vector.shape_cast %20 : vector<8xf32> to vector<8x1xf32>
    %c0_15 = arith.constant 0 : index
    %c0_16 = arith.constant 0 : index
    %22 = vector.load %arg7[%c0_15, %c0_16] : memref<1x1xf32, #tpu.memory_space<vmem>>, vector<1x1xf32>
    %23 = vector.broadcast %22 : vector<1x1xf32> to vector<8x1xf32>
    %24 = arith.addf %21, %23 : vector<8x1xf32>
    %c0_17 = arith.constant 0 : index
    %c0_18 = arith.constant 0 : index
    %25 = vector.load %arg8[%c0_17, %c0_18] : memref<8x1xf32, #tpu.memory_space<vmem>>, vector<8x1xf32>
    tpu.vector_store %arg8[%c0_17, %c0_18], %24 {strides = array<i32>} : memref<8x1xf32, #tpu.memory_space<vmem>>, vector<8x1xf32>,
    return
  }
  func.func @transform_0(%arg0: i32) -> (i32, i32) {
    %c0_i32 = arith.constant 0 : i32
    %c0_i32_0 = arith.constant 0 : i32
    return %arg0, %c0_i32 : i32, i32
  }
  func.func @transform_1(%arg0: i32) -> (i32, i32) {
    %c0_i32 = arith.constant 0 : i32
    %c0_i32_0 = arith.constant 0 : i32
    %c0_i32_1 = arith.constant 0 : i32
    return %c0_i32, %c0_i32_0 : i32, i32
  }
  func.func @transform_2(%arg0: i32) -> (i32, i32) {
    %c0_i32 = arith.constant 0 : i32
    %c0_i32_0 = arith.constant 0 : i32
    %c0_i32_1 = arith.constant 0 : i32
    return %c0_i32, %c0_i32_0 : i32, i32
  }
  func.func @transform_3(%arg0: i32) -> (i32, i32) {
    %c0_i32 = arith.constant 0 : i32
    %c0_i32_0 = arith.constant 0 : i32
    %c0_i32_1 = arith.constant 0 : i32
    return %c0_i32, %c0_i32_0 : i32, i32
  }
  func.func @transform_4(%arg0: i32) -> (i32, i32) {
    %c0_i32 = arith.constant 0 : i32
    %c0_i32_0 = arith.constant 0 : i32
    %c0_i32_1 = arith.constant 0 : i32
    return %c0_i32, %c0_i32_0 : i32, i32
  }
  func.func @transform_5(%arg0: i32) -> (i32, i32) {
    %c0_i32 = arith.constant 0 : i32
    %c0_i32_0 = arith.constant 0 : i32
    %c0_i32_1 = arith.constant 0 : i32
    return %c0_i32, %c0_i32_0 : i32, i32
  }
  func.func @transform_6(%arg0: i32) -> (i32, i32) {
    %c0_i32 = arith.constant 0 : i32
    %c0_i32_0 = arith.constant 0 : i32
    %c0_i32_1 = arith.constant 0 : i32
    return %c0_i32, %c0_i32_0 : i32, i32
  }
  func.func @transform_7(%arg0: i32) -> (i32, i32) {
    %c0_i32 = arith.constant 0 : i32
    %c0_i32_0 = arith.constant 0 : i32
    return %arg0, %c0_i32 : i32, i32
  }
}

</mosaic_0001>

<bundles_post_ra>
// kernel: linear_prob_forward.1
= control target key start
LH: loop header
LB: loop body
LE: loop exit
PB: predicated region body
PF: predicated region fallthrough
CT: control target
= control target key end

     0   :  { %s624_s26 = smov 0   ;;  %s675_s0 = inlined_call_operand.vmem [shape: f32[20,32], index: 0, kind: input, shape index: {}]   ;;  %s676_s1 = inlined_call_operand.vmem [shape: bf16[32,64], index: 1, kind: input, shape index: {}]   ;;  %s677_s2 = inlined_call_operand.vmem [shape: f32[1,64], index: 2, kind: input, shape index: {}]   ;;  %s678_s3 = inlined_call_operand.vmem [shape: bf16[64,64], index: 3, kind: input, shape index: {}]   ;;  %s679_s4 = inlined_call_operand.vmem [shape: f32[1,64], index: 4, kind: input, shape index: {}]   ;;  %s680_s5 = inlined_call_operand.vmem [shape: f32[1,64], index: 5, kind: input, shape index: {}]   ;;  %s681_s6 = inlined_call_operand.<no memory space> [shape: f32[1,1], index: 6, kind: input, shape index: {}]   ;;  %s682_s7 = inlined_call_operand.vmem [shape: f32[20,1], index: 7, kind: output, shape index: {}]  }
   0x1   :  { %v12_v0 = vstv %s681_s6 }
   0x2   :  { %13 = vst [vmem:[#allocation2] sm:$0x1] %v12_v0 }
   0x3 LB: > { %s506_s27 = sadd.s32 4294967295, %s577_s26   ;;  %p510_p0 = scmp.ge.s32.totalorder %s577_s26, 1  ;;  %s577_s26 = sphi %s624_s26, %s19_s26  }
   0x4   : > { %p238_p1 = scmp.lt.s32.totalorder %s577_s26, 4 }
   0x6   : > { %p239_p2 = pnand %p510_p0, %p238_p1 }
   0x7   : > { %v565_v1 = vld [vmem:[%s676_s1] sm:$0xff] (!%p239_p2)   ;;  %v579_v2 = vmov (!%p239_p2), 0.0   ;;  %v566_v3 = vld [vmem:[%s676_s1 + $0x8] sm:$0xff] (!%p239_p2)   ;;  %vm580_vm0 = vmmov (!%p239_p2), 0   ;;  %p268_p3 = scmp.lt.s32.totalorder (!%p239_p2), %s506_s27, 2  ;;  %vm302_vm1 = vcmask (!%p239_p2), 261120  }
   0x8   : > { %242 = sbr.rel (%p239_p2) target bundleno = 603 (0x25b), region = 48  ;;  %535 = vmatprep.subr.bf16.mxu0 (!%p239_p2), %v579_v2  ;;  %543 = vmatprep.subr.bf16.mxu1 (!%p239_p2), %v579_v2  ;;  %v567_v4 = vld [vmem:[%s678_s3] sm:$0xff] (!%p239_p2)   ;;  %v568_v5 = vld [vmem:[%s678_s3 + $0x8] sm:$0xff] (!%p239_p2)   ;;  %v569_v8 = vld [vmem:[%s678_s3 + $0x10] sm:$0xff] (!%p239_p2)   ;;  %vm387_vm2 = vcmask (!%p239_p2), 523264   ;;  %vm451_vm3 = vcmask (!%p239_p2), 7168  }
   0x9   : > { %536 = vmatpush3.bf16.msra.mxu0 (!%p239_p2), %v565_v1  ;;  %539 = vmatprep.mubr.msk.bf16.mxu0 (!%p239_p2), %vm580_vm0, %v579_v2  ;;  %v570_v9 = vld [vmem:[%s678_s3 + $0x18] sm:$0xff] (!%p239_p2)   ;;  %v513_v10 = vld [vmem:[%s677_s2] ss:$0 sm:$0xff] (!%p239_p2) }
   0xa   : > { %537 = vmatprep.subr.bf16.mxu0 (!%p239_p2), %v579_v2  ;;  %551 = vmatprep.mubr.msk.bf16.mxu1 (!%p239_p2), %vm580_vm0, %v579_v2  ;;  %v517_v18 = vld [vmem:[%s679_s4] ss:$0 sm:$0xff] (!%p239_p2) }
   0xb   : > { %544 = vmatpush3.bf16.msra.mxu1 (!%p239_p2), %v567_v4  ;;  %v523_v23 = vld [vmem:[%s680_s5] ss:$0 sm:$0xff] (!%p239_p2) }
   0xc   : > { %545 = vmatprep.subr.bf16.mxu1 (!%p239_p2), %v579_v2  ;;  %v524_v28 = vld [vmem:[#allocation2] ss:$0 sm:$0xff] (!%p239_p2) }
   0xd   : > { %538 = vmatpush3.bf16.msra.mxu0 (!%p239_p2), %v566_v3 }
   0xf   : > { %s684_s27 = smov (!%p268_p3, %s506_s27), 2  ;;  %546 = vmatpush3.bf16.msra.mxu1 %v568_v5 }
  0x10   : > { %s511_s12 = sshll.u32 %s684_s27, 3  ;;  %547 = vmatprep.subr.bf16.mxu1 %v579_v2 }
  0x11   : > { %s271_s15 = scalar_lea.vmem %s675_s0, %s511_s12  ;;  %s275_s6 = scalar_lea.vmem %s682_s7, %s511_s12 }
  0x12   : > { %v277_v6 = vld [vmem:[%s271_s15] sm:$0xff] }
  0x13   : > { %v278_v7 = vpack.c.bf16 %v277_v6, %v277_v6  ;;  %548 = vmatpush3.bf16.msra.mxu1 %v569_v8 }
  0x14   : > { %549 = vmatprep.subr.bf16.mxu1 %v579_v2 }
  0x15   : > { %540 = vmatmul.mubr.msk.bf16.vlgmr.msra.gmra.mrb[0].mxu0 %vm302_vm1, %v278_v7 }
  0x17   : > { %550 = vmatpush3.bf16.msra.mxu1 %v570_v9 }
  0xe8   : > { %v340_v11 = vpop.f32.mrb[0].mxu0 }
  0xe9   : > { %v341_v12 = vadd.f32 %v513_v10, %v340_v11  ;;  %v541_v13 = vpop.f32.mrb[1].mxu0 }
  0xea   : > { %v343_v14 = vpop.f32.mrb[2].mxu0 }
  0xeb   : > { %v346_v15 = vmax.f32 %v341_v12, 0.0  ;;  %v542_v16 = vpop.f32.mrb[3].mxu0 }
  0xed   : > { %v347_v17 = vpack.c.bf16 %v346_v15, %v346_v15 }
  0xef   : > { %552 = vmatmul.mubr.msk.bf16.vlgmr.msra.gmra.mrb[0].mxu1 %vm387_vm2, %v347_v17 }
 0x1c2   : > { %v425_v19 = vpop.f32.mrb[0].mxu1 }
 0x1c3   : > { %v426_v20 = vadd.f32 %v517_v18, %v425_v19  ;;  %v553_v21 = vpop.f32.mrb[1].mxu1 }
 0x1c4   : > { %v428_v22 = vpop.f32.mrb[2].mxu1 }
 0x1c5   : > { %v431_v24 = vmax.f32 %v426_v20, 0.0  ;;  %v554_v25 = vpop.f32.mrb[3].mxu1 }
 0x1c7   : > { %v439_v26 = vmul.f32 %v523_v23, %v431_v24 }
 0x1c9   : > { %v440_v27 = vsel %vm387_vm2, %v439_v26, 0.0 }
 0x1ca   : > { %441 = vadd.xlane.f32.xlu0 %v440_v27 }
 0x257   : > { %v442_v29 = vpop.xlane.xlu0 %441 }
 0x258   : > { %v450_v30 = vadd.f32 %v524_v28, %v442_v29 }
 0x25a   : > { %452 = vst.msk [vmem:[%s275_s6] sm:$0xff] %vm451_vm3, %v450_v30 }
 0x25b PF: > { %s19_s26 = sadd.s32 1, %s577_s26  }
 0x25c   : > { %p16_p4 = scmp.ge.s32.totalorder %s19_s26, 5  }
 0x25e   :  { %18 = sbr.rel (!%p16_p4) target bundleno = 3 (0x3), region = 78 }

</bundles_post_ra>
